<compile_context>
chip_gen: v7x
topology: tpu7x:2x2x1
jax: 0.10.0
libtpu: 0.0.40
codegen_flags: <defaults>
</compile_context>

<pallas_src>
import functools

import jax
import jax.numpy as jnp
from jax.experimental import pallas as pl
from jax.experimental.pallas import tpu as pltpu

_MIB = 1024 * 1024


def _round_up(n, m):
    return ((n + m - 1) // m) * m


def _pad2(a, rows, cols):
    r, c = a.shape
    if r == rows and c == cols:
        return a
    return jnp.pad(a, ((0, rows - r), (0, cols - c)))


def _tpu_vmem_and_cores():
    """Physical VMEM bytes and TensorCores-per-chip (best effort, safe fallback)."""
    vmem = None
    try:
        vmem = int(pltpu.get_tpu_info().vmem_capacity_bytes)
    except Exception:
        vmem = None
    kind = ""
    try:
        kind = (jax.devices()[0].device_kind or "").lower()
    except Exception:
        pass
    is_v7 = ("v7" in kind) or ("7x" in kind)
    if vmem is None:
        vmem = 64 * _MIB if is_v7 else 128 * _MIB
    num_tc = 2 if is_v7 else 1
    return vmem, num_tc


def _step_vmem_bytes(tm, th, dimp, itemsize, with_acc):
    """Per-grid-step live VMEM: double-buffered blocks + acc + h1/h3/h intermediates."""
    io_tiles = 2 * itemsize * (2 * tm * dimp + 3 * dimp * th)   # x, out, w1, w3, w2
    acc = 4 * tm * dimp if with_acc else 0                      # f32 accumulator
    inter = tm * th * (8 + itemsize)                            # h1, h3 (f32) + cast h
    return io_tiles + acc + inter


def _select_tiles(M, dim, hidden, itemsize, vmem_phys, num_tc, tm, th):
    """Pick (tm, th): biggest row tile that fits, preferring weights-resident th."""
    dimp = _round_up(dim, 128)
    hid_full = _round_up(hidden, 128)
    Mq = _round_up(M, 8)

    if tm is not None and th is not None:
        return _round_up(min(tm, Mq), 8), min(_round_up(th, 128), hid_full)

    budget = (3 * vmem_phys) // 4          # leave headroom for Mosaic internal scratch

    tm_max = Mq
    if num_tc >= 2 and Mq >= 16:
        # Keep >= 2 steps on the "parallel" row axis so both TCs get work.
        tm_max = min(tm_max, _round_up(pl.cdiv(M, num_tc), 8))

    if tm is not None:
        tm_cands = [_round_up(min(tm, tm_max), 8)]
    else:
        tm_cands = [c for c in (1024, 768, 512, 384, 256, 128, 64, 32, 16, 8)
                    if c <= tm_max]
        if tm_max not in tm_cands:
            tm_cands.append(tm_max)
        tm_cands = sorted(set(tm_cands), reverse=True)

    if th is not None:
        th_cands = [min(_round_up(th, 128), hid_full)]
    else:
        th_cands = [hid_full] + [c for c in (512, 256, 128) if c < hid_full]

    for tmc in tm_cands:
        for thc in th_cands:
            if _step_vmem_bytes(tmc, thc, dimp, itemsize, thc < hid_full) <= budget:
                return tmc, thc
    return tm_cands[-1], (128 if hid_full > 128 else hid_full)


def _bilinear_acc_kernel(x_ref, w1_ref, w3_ref, w2_ref, o_ref, acc_ref):
    # x_ref: (tm, dimp); w1/w3: (dimp, th); w2: (th, dimp); o: (tm, dimp)
    # acc_ref: (tm, dimp) f32 scratch carried across the hidden (k) axis.
    k = pl.program_id(1)

    @pl.when(k == 0)
    def _():
        acc_ref[...] = jnp.zeros_like(acc_ref)

    x = x_ref[...]
    h1 = jnp.dot(x, w1_ref[...], preferred_element_type=jnp.float32)
    h3 = jnp.dot(x, w3_ref[...], preferred_element_type=jnp.float32)
    h = (h1 * h3).astype(w2_ref.dtype)          # bilinear "gating" (no activation)
    acc_ref[...] += jnp.dot(h, w2_ref[...], preferred_element_type=jnp.float32)

    @pl.when(k == pl.num_programs(1) - 1)
    def _():
        o_ref[...] = acc_ref[...].astype(o_ref.dtype)
    # TODO(synk): dropout is identity here (module default dropout=None); a
    # training-mode dropout would use pltpu.prng_seed / prng_random_bits.


def _bilinear_resident_kernel(x_ref, w1_ref, w3_ref, w2_ref, o_ref):
    # Weights fit in one hidden tile: constant weight index_maps, no accumulator.
    x = x_ref[...]
    h1 = jnp.dot(x, w1_ref[...], preferred_element_type=jnp.float32)
    h3 = jnp.dot(x, w3_ref[...], preferred_element_type=jnp.float32)
    h = (h1 * h3).astype(w2_ref.dtype)
    o_ref[...] = jnp.dot(h, w2_ref[...],
                         preferred_element_type=jnp.float32).astype(o_ref.dtype)


@functools.partial(jax.jit, static_argnames=("tm", "th"))
def bilinear_forward(x, w1, w3, w2, *, tm=None, th=None):
    """x: (batch, seq, dim); w1/w3: (dim, hidden); w2: (hidden, dim).

    Weights are stored pre-transposed relative to torch.nn.Linear so the kernel
    computes plain row-major matmuls x @ W.  tm/th default to an auto choice
    based on the TPU generation's VMEM / core count.
    """
    batch, seq, dim = x.shape
    hidden = w1.shape[1]
    M = batch * seq
    itemsize = jnp.dtype(x.dtype).itemsize

    vmem_phys, num_tc = _tpu_vmem_and_cores()
    tm_eff, th_eff = _select_tiles(M, dim, hidden, itemsize, vmem_phys, num_tc, tm, th)

    dimp = _round_up(dim, 128)
    Mp = _round_up(M, tm_eff)
    hidp = _round_up(hidden, th_eff)
    kh = hidp // th_eff

    # Padding is a no-op when dim/hidden are already lane/tile aligned (the usual
    # case); there is no per-call weight repacking any more.
    x2d = _pad2(x.reshape(M, dim), Mp, dimp)
    w1p = _pad2(w1, dimp, hidp)
    w3p = _pad2(w3, dimp, hidp)
    w2p = _pad2(w2, hidp, dimp)

    # VMEM limit: sized to what this config actually needs, capped per generation
    # (v7x 64 MiB part -> 48 MiB; 128 MiB parts -> ~100 MiB).
    cap = 48 * _MIB if vmem_phys <= 64 * _MIB else 100 * _MIB
    need = _step_vmem_bytes(tm_eff, th_eff, dimp, itemsize, kh > 1) + 4 * _MIB
    vmem_limit = int(min(cap, max(32 * _MIB, need)))

    # Real HBM traffic: x + out once, weights once per row tile (once total when
    # they are resident, i.e. kh == 1).
    row_tiles = Mp // tm_eff
    weight_bytes = 3 * dimp * hidp * itemsize
    refetch = 1 if kh == 1 else row_tiles
    cost = pl.CostEstimate(
        flops=6 * Mp * dimp * hidp,
        transcendentals=0,
        bytes_accessed=2 * Mp * dimp * itemsize + refetch * weight_bytes,
    )

    if kh == 1:
        # Weights-resident fast path: only the row axis in the grid.
        grid_spec = pltpu.PrefetchScalarGridSpec(
            num_scalar_prefetch=0,
            grid=(row_tiles,),
            in_specs=[
                pl.BlockSpec((tm_eff, dimp), lambda i: (i, 0)),      # x rows
                pl.BlockSpec((dimp, hidp), lambda i: (0, 0)),        # W1 (resident)
                pl.BlockSpec((dimp, hidp), lambda i: (0, 0)),        # W3 (resident)
                pl.BlockSpec((hidp, dimp), lambda i: (0, 0)),        # W2 (resident)
            ],
            out_specs=pl.BlockSpec((tm_eff, dimp), lambda i: (i, 0)),
        )
        kernel = _bilinear_resident_kernel
        dim_sem = ("parallel",)
    else:
        grid_spec = pltpu.PrefetchScalarGridSpec(
            num_scalar_prefetch=0,
            grid=(row_tiles, kh),               # hidden (reduction) axis last
            in_specs=[
                pl.BlockSpec((tm_eff, dimp), lambda i, k: (i, 0)),   # x rows
                pl.BlockSpec((dimp, th_eff), lambda i, k: (0, k)),   # W1 tile k
                pl.BlockSpec((dimp, th_eff), lambda i, k: (0, k)),   # W3 tile k
                pl.BlockSpec((th_eff, dimp), lambda i, k: (k, 0)),   # W2 tile k
            ],
            out_specs=pl.BlockSpec((tm_eff, dimp), lambda i, k: (i, 0)),
            scratch_shapes=[pltpu.VMEM((tm_eff, dimp), jnp.float32)],
        )
        kernel = _bilinear_acc_kernel
        dim_sem = ("parallel", "arbitrary")

    out2d = pl.pallas_call(
        kernel,
        out_shape=jax.ShapeDtypeStruct((Mp, dimp), x.dtype),
        grid_spec=grid_spec,
        compiler_params=pltpu.CompilerParams(
            dimension_semantics=dim_sem,
            vmem_limit_bytes=vmem_limit,
        ),
        cost_estimate=cost,
    )(x2d, w1p, w3p, w2p)

    return out2d[:M, :dim].reshape(batch, seq, dim)


if __name__ == "__main__":
    key = jax.random.PRNGKey(0)
    kx, k1, k2, k3 = jax.random.split(key, 4)

    # Small but lane-friendly shapes: dim multiple of 128; hidden_dim per the
    # module's __init__ (hidden_dim=None branch) with multiple_of=128 -> 384.
    batch, seq, dim, multiple_of = 2, 8, 128, 128
    hidden = 4 * dim
    hidden = int(2 * hidden / 3)
    hidden = multiple_of * ((hidden + multiple_of - 1) // multiple_of)   # 384

    x = jax.random.normal(kx, (batch, seq, dim), jnp.float32)
    w1 = jax.random.normal(k1, (dim, hidden), jnp.float32) * 0.02
    w3 = jax.random.normal(k3, (dim, hidden), jnp.float32) * 0.02
    w2 = jax.random.normal(k2, (hidden, dim), jnp.float32) * 0.02

    x2d = x.reshape(-1, dim)
    ref = (((x2d @ w1) * (x2d @ w3)) @ w2).reshape(batch, seq, dim)

    # 1) Auto-tiled path: hidden fits one tile -> weights-resident kernel (kh == 1).
    out = jax.block_until_ready(bilinear_forward(x, w1, w3, w2))
    assert out.shape == ref.shape
    assert jnp.allclose(out, ref, atol=1e-3, rtol=1e-3), \
        float(jnp.max(jnp.abs(out - ref)))

    # 2) Forced hidden tiling (th=128 -> 3 tiles) to exercise the accumulator path.
    out_acc = jax.block_until_ready(bilinear_forward(x, w1, w3, w2, tm=8, th=128))
    assert jnp.allclose(out_acc, ref, atol=1e-3, rtol=1e-3), \
        float(jnp.max(jnp.abs(out_acc - ref)))

    # 3) bf16 path (production dtype: native MXU, half the weight DMA bytes).
    xb, w1b, w3b, w2b = (a.astype(jnp.bfloat16) for a in (x, w1, w3, w2))
    outb = jax.block_until_ready(bilinear_forward(xb, w1b, w3b, w2b))
    x2f = xb.astype(jnp.float32).reshape(-1, dim)
    hb = (x2f @ w1b.astype(jnp.float32)) * (x2f @ w3b.astype(jnp.float32))
    refb = (hb.astype(jnp.bfloat16).astype(jnp.float32)
            @ w2b.astype(jnp.float32)).reshape(batch, seq, dim)
    assert jnp.allclose(outb.astype(jnp.float32), refb, atol=5e-3, rtol=5e-2)

    print("KERNEL_OK")
</pallas_src>

<mosaic_0001>
module attributes {stable_mosaic.version = 11 : i64} {
  func.func @_bilinear_resident_kernel(%arg0: i32, %arg1: memref<16x128xf32, #tpu.memory_space<vmem>>, %arg2: memref<128x384xf32, #tpu.memory_space<vmem>>, %arg3: memref<128x384xf32, #tpu.memory_space<vmem>>, %arg4: memref<384x128xf32, #tpu.memory_space<vmem>>, %arg5: memref<16x128xf32, #tpu.memory_space<vmem>>) attributes {dimension_semantics = [#tpu.dimension_semantics<parallel>], iteration_bounds = array<i64: 1>, scalar_prefetch = 0 : i64, scratch_operands = 0 : i64, tpu.core_type = #tpu.core_type<tc>, window_params = [{transform_indices = @transform_0, window_bounds = array<i64: 16, 128>}, {pipeline_mode = #tpu.pipeline_mode<synchronous>, transform_indices = @transform_1, window_bounds = array<i64: 128, 384>}, {pipeline_mode = #tpu.pipeline_mode<synchronous>, transform_indices = @transform_2, window_bounds = array<i64: 128, 384>}, {pipeline_mode = #tpu.pipeline_mode<synchronous>, transform_indices = @transform_3, window_bounds = array<i64: 384, 128>}, {transform_indices = @transform_4, window_bounds = array<i64: 16, 128>}]} {
    %c0 = arith.constant 0 : index
    %c0_0 = arith.constant 0 : index
    %0 = vector.load %arg1[%c0, %c0_0] : memref<16x128xf32, #tpu.memory_space<vmem>>, vector<16x128xf32>
    %c0_1 = arith.constant 0 : index
    %c0_2 = arith.constant 0 : index
    %1 = vector.load %arg2[%c0_1, %c0_2] : memref<128x384xf32, #tpu.memory_space<vmem>>, vector<128x384xf32>
    %cst = arith.constant dense<0.000000e+00> : vector<16x384xf32>
    %2 = tpu.matmul %0, %1, %cst {dimension_numbers = #tpu.dot_dimension_numbers<[1], [0], [0], [1], [0, 0, 1, 1], [], []>} : vector<16x128xf32>, vector<128x384xf32>, vector<16x384xf32> -> vector<16x384xf32>
    %c0_3 = arith.constant 0 : index
    %c0_4 = arith.constant 0 : index
    %3 = vector.load %arg3[%c0_3, %c0_4] : memref<128x384xf32, #tpu.memory_space<vmem>>, vector<128x384xf32>
    %cst_5 = arith.constant dense<0.000000e+00> : vector<16x384xf32>
    %4 = tpu.matmul %0, %3, %cst_5 {dimension_numbers = #tpu.dot_dimension_numbers<[1], [0], [0], [1], [0, 0, 1, 1], [], []>} : vector<16x128xf32>, vector<128x384xf32>, vector<16x384xf32> -> vector<16x384xf32>
    %5 = arith.mulf %2, %4 : vector<16x384xf32>
    %c0_6 = arith.constant 0 : index
    %c0_7 = arith.constant 0 : index
    %6 = vector.load %arg4[%c0_6, %c0_7] : memref<384x128xf32, #tpu.memory_space<vmem>>, vector<384x128xf32>
    %cst_8 = arith.constant dense<0.000000e+00> : vector<16x128xf32>
    %7 = tpu.matmul %5, %6, %cst_8 {dimension_numbers = #tpu.dot_dimension_numbers<[1], [0], [0], [1], [0, 0, 1, 1], [], []>} : vector<16x384xf32>, vector<384x128xf32>, vector<16x128xf32> -> vector<16x128xf32>
    %c0_9 = arith.constant 0 : index
    %c0_10 = arith.constant 0 : index
    %8 = vector.load %arg5[%c0_9, %c0_10] : memref<16x128xf32, #tpu.memory_space<vmem>>, vector<16x128xf32>
    tpu.vector_store %arg5[%c0_9, %c0_10], %7 {strides = array<i32>} : memref<16x128xf32, #tpu.memory_space<vmem>>, vector<16x128xf32>,
    return
  }
  func.func @transform_0(%arg0: i32) -> (i32, i32) {
    %c0_i32 = arith.constant 0 : i32
    %c0_i32_0 = arith.constant 0 : i32
    return %arg0, %c0_i32 : i32, i32
  }
  func.func @transform_1(%arg0: i32) -> (i32, i32) {
    %c0_i32 = arith.constant 0 : i32
    %c0_i32_0 = arith.constant 0 : i32
    %c0_i32_1 = arith.constant 0 : i32
    return %c0_i32, %c0_i32_0 : i32, i32
  }
  func.func @transform_2(%arg0: i32) -> (i32, i32) {
    %c0_i32 = arith.constant 0 : i32
    %c0_i32_0 = arith.constant 0 : i32
    %c0_i32_1 = arith.constant 0 : i32
    return %c0_i32, %c0_i32_0 : i32, i32
  }
  func.func @transform_3(%arg0: i32) -> (i32, i32) {
    %c0_i32 = arith.constant 0 : i32
    %c0_i32_0 = arith.constant 0 : i32
    %c0_i32_1 = arith.constant 0 : i32
    return %c0_i32, %c0_i32_0 : i32, i32
  }
  func.func @transform_4(%arg0: i32) -> (i32, i32) {
    %c0_i32 = arith.constant 0 : i32
    %c0_i32_0 = arith.constant 0 : i32
    return %arg0, %c0_i32 : i32, i32
  }
}

</mosaic_0001>

<bundles_post_ra>
// kernel: bilinear_forward.1
= control target key start
LH: loop header
LB: loop body
LE: loop exit
PB: predicated region body
PF: predicated region fallthrough
CT: control target
= control target key end

     0   :  { %9 = vsyncpa [#allocation3], 0  ;;  %s1350_s0 = inlined_call_operand.hbm [shape: f32[16,128], index: 0, kind: input, shape index: {}]   ;;  %s1351_s1 = inlined_call_operand.hbm [shape: f32[128,384], index: 1, kind: input, shape index: {}]   ;;  %s1352_s2 = inlined_call_operand.hbm [shape: f32[128,384], index: 2, kind: input, shape index: {}]   ;;  %s1353_s3 = inlined_call_operand.hbm [shape: f32[384,128], index: 3, kind: input, shape index: {}]   ;;  %s1354_s4 = inlined_call_operand.hbm [shape: f32[16,128], index: 4, kind: output, shape index: {}]  }
   0x1   :  { %10 = vsyncpa [#allocation6], 0 }
   0x2   :  { %11 = vsyncpa [#allocation9], 0 }
   0x3   :  { %12 = vsyncpa [#allocation4], 0  ;;  %s1217_s15 = smov [#allocation5]   ;;  %s1099_s19 = scalar_lea.hbm %s1351_s1, 6144 }
   0x4   :  { %s30_s16 = sshll.u32 %s1217_s15, 4  ;;  %p1100_p0 = scmp.ne.s32.totalorder %s1351_s1, %s1099_s19  ;;  %s31_s16 = int_to_ptr.vmem [resolvable:$true] %s30_s16 }
   0x5   :  { %p1103_p1 = scmp.lt.u32.totalorder %s1099_s19, %s1351_s1 }
   0x7   :  { %p1105_p2 = pnand %p1103_p1, %p1100_p0 }
   0x9   :  { %1108 = shalt.err (!%p1105_p2)
}
   0xa   :  { %s1109_s24 = scalar_lea.vmem %s31_s16, 6144  ;;  %p1114_p4 = scmp.lt.s32.totalorder %s31_s16, %s31_s16 }
   0xb   :  { %p1110_p3 = scmp.ne.s32.totalorder %s31_s16, %s1109_s24  ;;  %p1115_p5 = scmp.lt.s32.totalorder %s1109_s24, %s1109_s24 }
   0xd   :  { %p1116_p6 = por %p1115_p5, %p1114_p4 }
   0xf   :  { %p1117_p7 = pnand %p1116_p6, %p1110_p3 }
  0x11   :  { %1120 = shalt.err (!%p1117_p7)
}
  0x12   :  { %s1218_s25 = smov 384   ;;  %s1219_s26 = smov 24  }
  0x13   :  { %36 = dma.hbm_to_vmem [thread:$0]  %s1351_s1, 6144, %s31_s16, [#allocation6], %s1218_s25, %s1218_s25, %s1219_s26  }
  0x14   :  { %s1220_s29 = smov [#allocation2]   ;;  %s1121_s7 = scalar_lea.hbm %s1350_s0, 256 }
  0x15   :  { %s18_s30 = sshll.u32 %s1220_s29, 4  ;;  %p1122_p8 = scmp.ne.s32.totalorder %s1350_s0, %s1121_s7  ;;  %s19_s30 = int_to_ptr.vmem [resolvable:$true] %s18_s30 }
  0x16   :  { %p1125_p9 = scmp.lt.u32.totalorder %s1121_s7, %s1350_s0 }
  0x18   :  { %p1127_p10 = pnand %p1125_p9, %p1122_p8 }
  0x1a   :  { %1130 = shalt.err (!%p1127_p10)
}
  0x1b   :  { %s1131_s12 = scalar_lea.vmem %s19_s30, 256  ;;  %p1136_p12 = scmp.lt.s32.totalorder %s19_s30, %s19_s30 }
  0x1c   :  { %p1132_p11 = scmp.ne.s32.totalorder %s19_s30, %s1131_s12  ;;  %p1137_p13 = scmp.lt.s32.totalorder %s1131_s12, %s1131_s12 }
  0x1e   :  { %p1138_p0 = por %p1137_p13, %p1136_p12 }
  0x20   :  { %p1139_p1 = pnand %p1138_p0, %p1132_p11 }
  0x22   :  { %1142 = shalt.err (!%p1139_p1)
}
  0x23   :  { %s1221_s1 = smov 128   ;;  %s1222_s13 = smov 8  }
  0x24   :  { %24 = dma.hbm_to_vmem [thread:$0]  %s1350_s0, 256, %s19_s30, [#allocation3], %s1221_s1, %s1221_s1, %s1222_s13  }
  0x25   :  { %s1223_s16 = smov [#allocation7]   ;;  %s1224_s18 = smov [#allocation8]  }
  0x26   :  { %s42_s17 = sshll.u32 %s1223_s16, 4  ;;  %s54_s19 = sshll.u32 %s1224_s18, 4  ;;  %s43_s17 = int_to_ptr.vmem [resolvable:$true] %s42_s17  ;;  %s1282_s19 = int_to_ptr.vmem [resolvable:$true] %s54_s19 }
  0x27   :  { %s1143_s22 = scalar_lea.hbm %s1352_s2, 6144 }
  0x28   :  { %p1144_p2 = scmp.ne.s32.totalorder %s1352_s2, %s1143_s22  ;;  %p1147_p3 = scmp.lt.u32.totalorder %s1143_s22, %s1352_s2 }
  0x2a   :  { %p1149_p4 = pnand %p1147_p3, %p1144_p2 }
  0x2c   :  { %1152 = shalt.err (!%p1149_p4)
}
  0x2d   :  { %s1153_s0 = scalar_lea.vmem %s43_s17, 6144  ;;  %p1158_p6 = scmp.lt.s32.totalorder %s43_s17, %s43_s17 }
  0x2e   :  { %p1154_p5 = scmp.ne.s32.totalorder %s43_s17, %s1153_s0  ;;  %p1159_p7 = scmp.lt.s32.totalorder %s1153_s0, %s1153_s0 }
  0x30   :  { %p1160_p8 = por %p1159_p7, %p1158_p6 }
  0x32   :  { %p1161_p9 = pnand %p1160_p8, %p1154_p5 }
  0x34   :  { %1164 = shalt.err (!%p1161_p9)
}
  0x35   :  { %48 = dma.hbm_to_vmem [thread:$0]  %s1352_s2, 6144, %s43_s17, [#allocation6], %s1218_s25, %s1218_s25, %s1219_s26  }
  0x36   :  { %s1165_s7 = scalar_lea.hbm %s1353_s3, 6144 }
  0x37   :  { %p1166_p10 = scmp.ne.s32.totalorder %s1353_s3, %s1165_s7  ;;  %p1169_p11 = scmp.lt.u32.totalorder %s1165_s7, %s1353_s3 }
  0x39   :  { %p1171_p12 = pnand %p1169_p11, %p1166_p10 }
  0x3b   :  { %1174 = shalt.err (!%p1171_p12)
}
  0x3c   :  { %s1175_s12 = scalar_lea.vmem %s1282_s19, 6144  ;;  %p1180_p0 = scmp.lt.s32.totalorder %s1282_s19, %s1282_s19 }
  0x3d   :  { %p1176_p13 = scmp.ne.s32.totalorder %s1282_s19, %s1175_s12  ;;  %p1181_p1 = scmp.lt.s32.totalorder %s1175_s12, %s1175_s12 }
  0x3f   :  { %p1182_p2 = por %p1181_p1, %p1180_p0 }
  0x41   :  { %p1183_p3 = pnand %p1182_p2, %p1176_p13 }
  0x43   :  { %1186 = shalt.err (!%p1183_p3)
}
  0x44   :  { %60 = dma.hbm_to_vmem [thread:$0]  %s1353_s3, 6144, %s1282_s19, [#allocation9], %s1221_s1, %s1221_s1, %s1222_s13  }
  0x45   :  { %1209 = dma.done.wait [#allocation3], 256  }
  0x46   :  { %1210 = vsyncadd [#allocation3], 4294967040 }
  0x47   :  { %1211 = dma.done.wait [#allocation6], 12288  }
  0x48   :  { %1212 = vsyncadd [#allocation6], 4294955008 }
  0x49   :  { %1213 = dma.done.wait [#allocation9], 6144  }
  0x4a   :  { %1214 = vsyncadd [#allocation9], 4294961152  ;;  %v1225_v0 = vmov 0.0   ;;  %v76_v1 = vld [vmem:[#allocation5 + $0x8] sm:$0xff]  ;;  %v79_v2 = vld [vmem:[#allocation5 + $0x20] sm:$0xff]  ;;  %s1226_s3 = smov [#allocation10]  }
  0x4b   :  { %187 = vmatprep.mubr.f32.mxu0 %v1225_v0  ;;  %v77_v3 = vld [vmem:[#allocation5 + $0x10] sm:$0xff]  ;;  %v897_v4 = vpack.c.bf16 %v79_v2, %v76_v1  ;;  %v80_v5 = vld [vmem:[#allocation5 + $0x28] sm:$0xff]  ;;  %v75_v6 = vld [vmem:[#allocation5] sm:$0xff]  ;;  %s686_s26 = sshll.u32 %s1226_s3, 4  ;;  %s687_s26 = int_to_ptr.vmem [resolvable:$true] %s686_s26 }
  0x4c   :  { %v78_v7 = vld [vmem:[#allocation5 + $0x18] sm:$0xff]  ;;  %v929_v8 = vpack.c.bf16 %v80_v5, %v77_v3  ;;  %v85_v11 = vld [vmem:[#allocation5 + $0x50] sm:$0xff]  ;;  %v83_v12 = vld [vmem:[#allocation5 + $0x40] sm:$0xff]  ;;  %s1187_s14 = scalar_lea.vmem %s687_s26, 256  ;;  %p1192_p5 = scmp.lt.s32.totalorder %s687_s26, %s687_s26 }
  0x4d   :  { %v899_v9 = vpack.c.bf16 %v78_v7, %v75_v6  ;;  %v82_v10 = vld [vmem:[#allocation5 + $0x38] sm:$0xff]  ;;  %898 = vmatprep.subr.bf16.mxu0 %v897_v4  ;;  %v81_v15 = vld [vmem:[#allocation5 + $0x30] sm:$0xff]  ;;  %v84_v16 = vld [vmem:[#allocation5 + $0x48] sm:$0xff]  ;;  %p1188_p4 = scmp.ne.s32.totalorder %s687_s26, %s1187_s14  ;;  %p1193_p6 = scmp.lt.s32.totalorder %s1187_s14, %s1187_s14 }
  0x4e   :  { %v901_v13 = vpack.c.bf16 %v85_v11, %v82_v10  ;;  %v86_v14 = vld [vmem:[#allocation5 + $0x58] sm:$0xff]  ;;  %930 = vmatprep.subr.bf16.mxu1 %v929_v8  ;;  %v903_v18 = vpack.c.bf16 %v84_v16, %v81_v15  ;;  %v88_v19 = vld [vmem:[#allocation5 + $0x68] sm:$0xff]  ;;  %v91_v20 = vld [vmem:[#allocation5 + $0x80] sm:$0xff] }
  0x4f   :  { %900 = vmatpush1.bf16.msra.mxu0 %v899_v9  ;;  %v933_v17 = vpack.c.bf16 %v86_v14, %v83_v12  ;;  %v89_v21 = vld [vmem:[#allocation5 + $0x70] sm:$0xff]  ;;  %932 = vmatpush3.bf16.msra.mxu1 %v929_v8  ;;  %v905_v22 = vpack.c.bf16 %v91_v20, %v88_v19  ;;  %v92_v23 = vld [vmem:[#allocation5 + $0x88] sm:$0xff]  ;;  %v87_v24 = vld [vmem:[#allocation5 + $0x60] sm:$0xff]  ;;  %p1194_p7 = por %p1193_p6, %p1192_p5 }
  0x50   :  { %902 = vmatprep.subr.bf16.mxu0 %v901_v13  ;;  %v90_v25 = vld [vmem:[#allocation5 + $0x78] sm:$0xff]  ;;  %v937_v26 = vpack.c.bf16 %v92_v23, %v89_v21  ;;  %v97_v28 = vld [vmem:[#allocation5 + $0xb0] sm:$0xff]  ;;  %v95_v29 = vld [vmem:[#allocation5 + $0xa0] sm:$0xff] }
  0x51   :  { %934 = vmatprep.subr.bf16.mxu1 %v933_v17  ;;  %v94_v27 = vld [vmem:[#allocation5 + $0x98] sm:$0xff]  ;;  %v907_v31 = vpack.c.bf16 %v90_v25, %v87_v24  ;;  %v93_v33 = vld [vmem:[#allocation5 + $0x90] sm:$0xff]  ;;  %v96_v34 = vld [vmem:[#allocation5 + $0xa8] sm:$0xff]  ;;  %p1195_p8 = pnand %p1194_p7, %p1188_p4 }
  0x52   :  { %v98_v30 = vld [vmem:[#allocation5 + $0xb8] sm:$0xff]  ;;  %v909_v32 = vpack.c.bf16 %v97_v28, %v94_v27  ;;  %v100_v36 = vld [vmem:[#allocation5 + $0xc8] sm:$0xff]  ;;  %v103_v37 = vld [vmem:[#allocation5 + $0xe0] sm:$0xff]  ;;  %v911_v40 = vpack.c.bf16 %v96_v34, %v93_v33 }
  0x53   :  { %904 = vmatpush1.bf16.msra.mxu0 %v903_v18  ;;  %936 = vmatpush3.bf16.msra.mxu1 %v933_v17  ;;  %v941_v35 = vpack.c.bf16 %v98_v30, %v95_v29  ;;  %v101_v38 = vld [vmem:[#allocation5 + $0xd0] sm:$0xff]  ;;  %v104_v39 = vld [vmem:[#allocation5 + $0xe8] sm:$0xff]  ;;  %v913_v41 = vpack.c.bf16 %v103_v37, %v100_v36  ;;  %v99_v42 = vld [vmem:[#allocation5 + $0xc0] sm:$0xff] }
  0x54   :  { %906 = vmatprep.subr.bf16.mxu0 %v905_v22  ;;  %938 = vmatprep.subr.bf16.mxu1 %v937_v26  ;;  %v102_v43 = vld [vmem:[#allocation5 + $0xd8] sm:$0xff]  ;;  %v945_v44 = vpack.c.bf16 %v104_v39, %v101_v38  ;;  %v109_v46 = vld [vmem:[#allocation5 + $0x110] sm:$0xff]  ;;  %v107_v47 = vld [vmem:[#allocation5 + $0x100] sm:$0xff] }
  0x55   :  { %v106_v45 = vld [vmem:[#allocation5 + $0xf8] sm:$0xff]  ;;  %v915_v49 = vpack.c.bf16 %v102_v43, %v99_v42  ;;  %v1320_v50 = vld [vmem:[#allocation2] sm:$0xff]  ;;  %v108_v53 = vld [vmem:[#allocation5 + $0x108] sm:$0xff] }
  0x56   :  { %v110_v48 = vld [vmem:[#allocation5 + $0x118] sm:$0xff]  ;;  %v917_v51 = vpack.c.bf16 %v109_v46, %v106_v45  ;;  %v105_v52 = vld [vmem:[#allocation5 + $0xf0] sm:$0xff]  ;;  %v112_v55 = vld [vmem:[#allocation5 + $0x128] sm:$0xff]  ;;  %824 = vmatprep.mubr.f32.mxu1 %v1320_v50 }
  0x57   :  { %908 = vmatpush1.bf16.msra.mxu0 %v907_v31  ;;  %940 = vmatpush3.bf16.msra.mxu1 %v937_v26  ;;  %v949_v54 = vpack.c.bf16 %v110_v48, %v107_v47  ;;  %v115_v56 = vld [vmem:[#allocation5 + $0x140] sm:$0xff]  ;;  %v113_v57 = vld [vmem:[#allocation5 + $0x130] sm:$0xff]  ;;  %v116_v58 = vld [vmem:[#allocation5 + $0x148] sm:$0xff]  ;;  %v919_v59 = vpack.c.bf16 %v108_v53, %v105_v52 }
  0x58   :  { %910 = vmatprep.subr.bf16.mxu0 %v909_v32  ;;  %942 = vmatprep.subr.bf16.mxu1 %v941_v35  ;;  %v921_v60 = vpack.c.bf16 %v115_v56, %v112_v55  ;;  %v111_v61 = vld [vmem:[#allocation5 + $0x120] sm:$0xff]  ;;  %v114_v62 = vld [vmem:[#allocation5 + $0x138] sm:$0xff]  ;;  %v953_v63 = vpack.c.bf16 %v116_v58, %v113_v57  ;;  %v121_v2 = vld [vmem:[#allocation5 + $0x170] sm:$0xff] }
  0x59   :  { %v118_v1 = vld [vmem:[#allocation5 + $0x158] sm:$0xff]  ;;  %v119_v3 = vld [vmem:[#allocation5 + $0x160] sm:$0xff]  ;;  %v923_v5 = vpack.c.bf16 %v114_v62, %v111_v61  ;;  %v117_v7 = vld [vmem:[#allocation5 + $0x150] sm:$0xff] }
  0x5a   :  { %v122_v4 = vld [vmem:[#allocation5 + $0x178] sm:$0xff]  ;;  %v925_v6 = vpack.c.bf16 %v121_v2, %v118_v1  ;;  %v120_v8 = vld [vmem:[#allocation5 + $0x168] sm:$0xff]  ;;  %v279_v11 = vld [vmem:[#allocation7 + $0x20] sm:$0xff] }
  0x5b   :  { %912 = vmatpush1.bf16.msra.mxu0 %v911_v40  ;;  %944 = vmatpush3.bf16.msra.mxu1 %v941_v35  ;;  %v957_v9 = vpack.c.bf16 %v122_v4, %v119_v3  ;;  %v276_v10 = vld [vmem:[#allocation7 + $0x8] sm:$0xff]  ;;  %v277_v12 = vld [vmem:[#allocation7 + $0x10] sm:$0xff]  ;;  %v927_v14 = vpack.c.bf16 %v120_v8, %v117_v7  ;;  %v275_v16 = vld [vmem:[#allocation7] sm:$0xff] }
  0x5c   :  { %914 = vmatprep.subr.bf16.mxu0 %v913_v41  ;;  %946 = vmatprep.subr.bf16.mxu1 %v945_v44  ;;  %v280_v13 = vld [vmem:[#allocation7 + $0x28] sm:$0xff]  ;;  %v961_v15 = vpack.c.bf16 %v279_v11, %v276_v10  ;;  %v278_v17 = vld [vmem:[#allocation7 + $0x18] sm:$0xff]  ;;  %v285_v20 = vld [vmem:[#allocation7 + $0x50] sm:$0xff] }
  0x5d   :  { %v993_v18 = vpack.c.bf16 %v280_v13, %v277_v12  ;;  %v282_v19 = vld [vmem:[#allocation7 + $0x38] sm:$0xff]  ;;  %v283_v21 = vld [vmem:[#allocation7 + $0x40] sm:$0xff]  ;;  %v963_v23 = vpack.c.bf16 %v278_v17, %v275_v16  ;;  %v281_v26 = vld [vmem:[#allocation7 + $0x30] sm:$0xff] }
  0x5e   :  { %v286_v22 = vld [vmem:[#allocation7 + $0x58] sm:$0xff]  ;;  %v965_v25 = vpack.c.bf16 %v285_v20, %v282_v19  ;;  %v284_v27 = vld [vmem:[#allocation7 + $0x48] sm:$0xff]  ;;  %v291_v30 = vld [vmem:[#allocation7 + $0x80] sm:$0xff] }
  0x5f   :  { %916 = vmatpush1.bf16.msra.mxu0 %v915_v49  ;;  %948 = vmatpush3.bf16.msra.mxu1 %v945_v44  ;;  %v1323_v24 = vld [vmem:[#allocation2 + $0x8] sm:$0xff]  ;;  %v997_v28 = vpack.c.bf16 %v286_v22, %v283_v21  ;;  %v288_v29 = vld [vmem:[#allocation7 + $0x68] sm:$0xff]  ;;  %v289_v31 = vld [vmem:[#allocation7 + $0x70] sm:$0xff]  ;;  %v967_v33 = vpack.c.bf16 %v284_v27, %v281_v26 }
  0x60   :  { %918 = vmatprep.subr.bf16.mxu0 %v917_v51  ;;  %950 = vmatprep.subr.bf16.mxu1 %v949_v54  ;;  %v292_v32 = vld [vmem:[#allocation7 + $0x88] sm:$0xff]  ;;  %v969_v34 = vpack.c.bf16 %v291_v30, %v288_v29  ;;  %v287_v35 = vld [vmem:[#allocation7 + $0x60] sm:$0xff]  ;;  %v290_v36 = vld [vmem:[#allocation7 + $0x78] sm:$0xff] }
  0x61   :  { %v1001_v37 = vpack.c.bf16 %v292_v32, %v289_v31  ;;  %v294_v38 = vld [vmem:[#allocation7 + $0x98] sm:$0xff]  ;;  %v297_v39 = vld [vmem:[#allocation7 + $0xb0] sm:$0xff]  ;;  %v295_v40 = vld [vmem:[#allocation7 + $0xa0] sm:$0xff]  ;;  %v971_v42 = vpack.c.bf16 %v290_v36, %v287_v35 }
  0x62   :  { %v298_v41 = vld [vmem:[#allocation7 + $0xb8] sm:$0xff]  ;;  %v973_v43 = vpack.c.bf16 %v297_v39, %v294_v38  ;;  %v293_v44 = vld [vmem:[#allocation7 + $0x90] sm:$0xff]  ;;  %v296_v45 = vld [vmem:[#allocation7 + $0xa8] sm:$0xff] }
  0x63   :  { %920 = vmatpush1.bf16.msra.mxu0 %v919_v59  ;;  %952 = vmatpush3.bf16.msra.mxu1 %v949_v54  ;;  %v1005_v46 = vpack.c.bf16 %v298_v41, %v295_v40  ;;  %v300_v47 = vld [vmem:[#allocation7 + $0xc8] sm:$0xff]  ;;  %v303_v48 = vld [vmem:[#allocation7 + $0xe0] sm:$0xff]  ;;  %v301_v49 = vld [vmem:[#allocation7 + $0xd0] sm:$0xff]  ;;  %v975_v52 = vpack.c.bf16 %v296_v45, %v293_v44 }
  0x64   :  { %922 = vmatprep.subr.bf16.mxu0 %v921_v60  ;;  %954 = vmatprep.subr.bf16.mxu1 %v953_v63  ;;  %v304_v51 = vld [vmem:[#allocation7 + $0xe8] sm:$0xff]  ;;  %v977_v53 = vpack.c.bf16 %v303_v48, %v300_v47  ;;  %v299_v54 = vld [vmem:[#allocation7 + $0xc0] sm:$0xff]  ;;  %v302_v55 = vld [vmem:[#allocation7 + $0xd8] sm:$0xff] }
  0x65   :  { %v1009_v56 = vpack.c.bf16 %v304_v51, %v301_v49  ;;  %v306_v57 = vld [vmem:[#allocation7 + $0xf8] sm:$0xff]  ;;  %v309_v58 = vld [vmem:[#allocation7 + $0x110] sm:$0xff]  ;;  %v307_v59 = vld [vmem:[#allocation7 + $0x100] sm:$0xff]  ;;  %v979_v61 = vpack.c.bf16 %v302_v55, %v299_v54 }
  0x66   :  { %v310_v60 = vld [vmem:[#allocation7 + $0x118] sm:$0xff]  ;;  %v981_v62 = vpack.c.bf16 %v309_v58, %v306_v57  ;;  %v308_v1 = vld [vmem:[#allocation7 + $0x108] sm:$0xff]  ;;  %v315_v4 = vld [vmem:[#allocation7 + $0x140] sm:$0xff] }
  0x67   :  { %924 = vmatpush1.bf16.msra.mxu0 %v923_v5  ;;  %956 = vmatpush3.bf16.msra.mxu1 %v953_v63  ;;  %v305_v63 = vld [vmem:[#allocation7 + $0xf0] sm:$0xff]  ;;  %v1013_v2 = vpack.c.bf16 %v310_v60, %v307_v59  ;;  %v312_v3 = vld [vmem:[#allocation7 + $0x128] sm:$0xff]  ;;  %v314_v10 = vld [vmem:[#allocation7 + $0x138] sm:$0xff] }
  0x68   :  { %926 = vmatprep.subr.bf16.mxu0 %v925_v6  ;;  %958 = vmatprep.subr.bf16.mxu1 %v957_v9  ;;  %v313_v5 = vld [vmem:[#allocation7 + $0x130] sm:$0xff]  ;;  %v316_v6 = vld [vmem:[#allocation7 + $0x148] sm:$0xff]  ;;  %v983_v7 = vpack.c.bf16 %v308_v1, %v305_v63  ;;  %v985_v8 = vpack.c.bf16 %v315_v4, %v312_v3  ;;  %v318_v12 = vld [vmem:[#allocation7 + $0x158] sm:$0xff] }
  0x69   :  { %v1017_v11 = vpack.c.bf16 %v316_v6, %v313_v5  ;;  %v321_v13 = vld [vmem:[#allocation7 + $0x170] sm:$0xff]  ;;  %v320_v19 = vld [vmem:[#allocation7 + $0x168] sm:$0xff]  ;;  %v497_v22 = vld [vmem:[#allocation8 + $0x80] sm:$0xff] }
  0x6a   :  { %v989_v17 = vpack.c.bf16 %v321_v13, %v318_v12  ;;  %v514_v27 = vld [vmem:[#allocation8 + $0x108] sm:$0xff]  ;;  %v499_v32 = vld [vmem:[#allocation8 + $0x90] sm:$0xff]  ;;  %v516_v35 = vld [vmem:[#allocation8 + $0x118] sm:$0xff] }
  0x6b   :  { %928 = vmatpush1.bf16.msra.mxu0 %v927_v14  ;;  %960 = vmatpush3.bf16.msra.mxu1 %v957_v9  ;;  %v311_v9 = vld [vmem:[#allocation7 + $0x120] sm:$0xff]  ;;  %v482_v29 = vld [vmem:[#allocation8 + $0x8] sm:$0xff]  ;;  %v483_v36 = vld [vmem:[#allocation8 + $0x10] sm:$0xff] }
  0x6c   :  { %962 = vmatprep.subr.bf16.mxu0 %v961_v15  ;;  %994 = vmatprep.subr.bf16.mxu1 %v993_v18  ;;  %v319_v14 = vld [vmem:[#allocation7 + $0x160] sm:$0xff]  ;;  %v322_v15 = vld [vmem:[#allocation7 + $0x178] sm:$0xff]  ;;  %v987_v16 = vpack.c.bf16 %v314_v10, %v311_v9  ;;  %v502_v39 = vld [vmem:[#allocation8 + $0xa8] sm:$0xff] }
  0x6d   :  { %v1021_v20 = vpack.c.bf16 %v322_v15, %v319_v14  ;;  %v501_v38 = vld [vmem:[#allocation8 + $0xa0] sm:$0xff]  ;;  %v486_v44 = vld [vmem:[#allocation8 + $0x28] sm:$0xff]  ;;  %v504_v47 = vld [vmem:[#allocation8 + $0xb8] sm:$0xff] }
  0x6e   :  { %188 = vmatmul.mubr.f32.vlgmr.msra.gmra.mrb[0].mxu0 %v1320_v50  ;;  %825 = vmatmul.mubr.f32.vlgmr.msra.gmra.mrb[0].mxu1 %v1323_v24  ;;  %v517_v40 = vld [vmem:[#allocation8 + $0x120] sm:$0xff]  ;;  %v1033_v41 = vpack.c.bf16 %v502_v39, %v501_v38  ;;  %v519_v48 = vld [vmem:[#allocation8 + $0x130] sm:$0xff]  ;;  %v520_v49 = vld [vmem:[#allocation8 + $0x138] sm:$0xff] }
  0x6f   :  { %964 = vmatpush1.bf16.msra.mxu0 %v963_v23  ;;  %996 = vmatpush3.bf16.msra.mxu1 %v993_v18  ;;  %v317_v18 = vld [vmem:[#allocation7 + $0x150] sm:$0xff]  ;;  %v498_v23 = vld [vmem:[#allocation8 + $0x88] sm:$0xff]  ;;  %v488_v54 = vld [vmem:[#allocation8 + $0x38] sm:$0xff]  ;;  %v1069_v55 = vpack.c.bf16 %v520_v49, %v519_v48 }
  0x70   :  { %966 = vmatprep.subr.bf16.mxu0 %v965_v25  ;;  %998 = vmatprep.subr.bf16.mxu1 %v997_v28  ;;  %v991_v21 = vpack.c.bf16 %v320_v19, %v317_v18  ;;  %v513_v25 = vld [vmem:[#allocation8 + $0x100] sm:$0xff]  ;;  %v1025_v26 = vpack.c.bf16 %v498_v23, %v497_v22  ;;  %v506_v57 = vld [vmem:[#allocation8 + $0xc8] sm:$0xff]  ;;  %v508_v3 = vld [vmem:[#allocation8 + $0xd8] sm:$0xff] }
  0x71   :  { %193 = vmatprep.mubr.f32.mxu0 %v1225_v0  ;;  %859 = vmatprep.mubr.f32.mxu1 %v1320_v50  ;;  %v1057_v30 = vpack.c.bf16 %v514_v27, %v513_v25  ;;  %v521_v58 = vld [vmem:[#allocation8 + $0x140] sm:$0xff]  ;;  %v522_v59 = vld [vmem:[#allocation8 + $0x148] sm:$0xff]  ;;  %v523_v4 = vld [vmem:[#allocation8 + $0x150] sm:$0xff] }
  0x72   :  { %194 = vmatmul.mubr.f32.gmra.mrb[2].mxu0 %v1323_v24  ;;  %v490_v63 = vld [vmem:[#allocation8 + $0x48] sm:$0xff]  ;;  %v1073_v1 = vpack.c.bf16 %v522_v59, %v521_v58  ;;  %v524_v5 = vld [vmem:[#allocation8 + $0x158] sm:$0xff]  ;;  %v525_v13 = vld [vmem:[#allocation8 + $0x160] sm:$0xff] }
  0x73   :  { %968 = vmatpush1.bf16.msra.mxu0 %v967_v33  ;;  %387 = vmatprep.mubr.f32.mxu0 %v1225_v0  ;;  %v500_v33 = vld [vmem:[#allocation8 + $0x98] sm:$0xff]  ;;  %v1077_v10 = vpack.c.bf16 %v524_v5, %v523_v4  ;;  %v510_v12 = vld [vmem:[#allocation8 + $0xe8] sm:$0xff]  ;;  %v527_v23 = vld [vmem:[#allocation8 + $0x170] sm:$0xff] }
  0x74   :  { %1000 = vmatpush3.bf16.msra.mxu1 %v997_v28  ;;  %970 = vmatprep.subr.bf16.mxu0 %v969_v34  ;;  %v481_v28 = vld [vmem:[#allocation8] sm:$0xff]  ;;  %v515_v34 = vld [vmem:[#allocation8 + $0x110] sm:$0xff]  ;;  %v492_v9 = vld [vmem:[#allocation8 + $0x58] sm:$0xff] }
  0x75   :  { %1002 = vmatprep.subr.bf16.mxu1 %v1001_v37  ;;  %v1027_v31 = vpack.c.bf16 %v482_v29, %v481_v28  ;;  %v526_v14 = vld [vmem:[#allocation8 + $0x168] sm:$0xff]  ;;  %v512_v22 = vld [vmem:[#allocation8 + $0xf8] sm:$0xff]  ;;  %v495_v27 = vld [vmem:[#allocation8 + $0x70] sm:$0xff] }
  0x76   :  { %v494_v18 = vld [vmem:[#allocation8 + $0x68] sm:$0xff]  ;;  %v1081_v19 = vpack.c.bf16 %v526_v14, %v525_v13  ;;  %v496_v28 = vld [vmem:[#allocation8 + $0x78] sm:$0xff] }
  0x77   :  { %972 = vmatpush1.bf16.msra.mxu0 %v971_v42  ;;  %v518_v42 = vld [vmem:[#allocation8 + $0x128] sm:$0xff] }
  0x78   :  { %1004 = vmatpush3.bf16.msra.mxu1 %v1001_v37  ;;  %974 = vmatprep.subr.bf16.mxu0 %v973_v43  ;;  %v484_v37 = vld [vmem:[#allocation8 + $0x18] sm:$0xff]  ;;  %v485_v43 = vld [vmem:[#allocation8 + $0x20] sm:$0xff]  ;;  %v1065_v45 = vpack.c.bf16 %v518_v42, %v517_v40 }
  0x79   :  { %1006 = vmatprep.subr.bf16.mxu1 %v1005_v46  ;;  %v1035_v51 = vpack.c.bf16 %v486_v44, %v485_v43 }
  0x7b   :  { %976 = vmatpush1.bf16.msra.mxu0 %v975_v52 }
  0x7c   :  { %1008 = vmatpush3.bf16.msra.mxu1 %v1005_v46  ;;  %978 = vmatprep.subr.bf16.mxu0 %v977_v53  ;;  %v503_v46 = vld [vmem:[#allocation8 + $0xb0] sm:$0xff] }
  0x7d   :  { %1010 = vmatprep.subr.bf16.mxu1 %v1009_v56  ;;  %v1037_v52 = vpack.c.bf16 %v504_v47, %v503_v46  ;;  %v487_v53 = vld [vmem:[#allocation8 + $0x30] sm:$0xff] }
  0x7e   :  { %v1039_v60 = vpack.c.bf16 %v488_v54, %v487_v53 }
  0x7f   :  { %980 = vmatpush1.bf16.msra.mxu0 %v979_v61 }
  0x80   :  { %1012 = vmatpush3.bf16.msra.mxu1 %v1009_v56  ;;  %982 = vmatprep.subr.bf16.mxu0 %v981_v62  ;;  %v505_v56 = vld [vmem:[#allocation8 + $0xc0] sm:$0xff] }
  0x81   :  { %1014 = vmatprep.subr.bf16.mxu1 %v1013_v2  ;;  %v1041_v61 = vpack.c.bf16 %v506_v57, %v505_v56  ;;  %v489_v62 = vld [vmem:[#allocation8 + $0x40] sm:$0xff] }
  0x82   :  { %v1043_v6 = vpack.c.bf16 %v490_v63, %v489_v62 }
  0x83   :  { %984 = vmatpush1.bf16.msra.mxu0 %v983_v7 }
  0x84   :  { %1016 = vmatpush3.bf16.msra.mxu1 %v1013_v2  ;;  %986 = vmatprep.subr.bf16.mxu0 %v985_v8  ;;  %v507_v2 = vld [vmem:[#allocation8 + $0xd0] sm:$0xff] }
  0x85   :  { %1018 = vmatprep.subr.bf16.mxu1 %v1017_v11  ;;  %v1045_v7 = vpack.c.bf16 %v508_v3, %v507_v2  ;;  %v491_v8 = vld [vmem:[#allocation8 + $0x50] sm:$0xff] }
  0x86   :  { %v1047_v15 = vpack.c.bf16 %v492_v9, %v491_v8 }
  0x87   :  { %988 = vmatpush1.bf16.msra.mxu0 %v987_v16 }
  0x88   :  { %1020 = vmatpush3.bf16.msra.mxu1 %v1017_v11  ;;  %990 = vmatprep.subr.bf16.mxu0 %v989_v17  ;;  %v509_v11 = vld [vmem:[#allocation8 + $0xe0] sm:$0xff] }
  0x89   :  { %1022 = vmatprep.subr.bf16.mxu1 %v1021_v20  ;;  %v1049_v16 = vpack.c.bf16 %v510_v12, %v509_v11  ;;  %v493_v17 = vld [vmem:[#allocation8 + $0x60] sm:$0xff] }
  0x8b   :  { %992 = vmatpush1.bf16.msra.mxu0 %v991_v21  ;;  %v511_v21 = vld [vmem:[#allocation8 + $0xf0] sm:$0xff] }
  0x8c   :  { %1024 = vmatpush3.bf16.msra.mxu1 %v1021_v20  ;;  %1026 = vmatprep.subr.bf16.mxu0 %v1025_v26  ;;  %v1051_v20 = vpack.c.bf16 %v494_v18, %v493_v17  ;;  %v1053_v25 = vpack.c.bf16 %v512_v22, %v511_v21  ;;  %v528_v26 = vld [vmem:[#allocation8 + $0x178] sm:$0xff] }
  0x8d   :  { %1058 = vmatprep.subr.bf16.mxu1 %v1057_v30  ;;  %v1085_v29 = vpack.c.bf16 %v528_v26, %v527_v23 }
  0x8e   :  { %388 = vmatmul.mubr.f32.vlgmr.msra.gmra.mrb[4].mxu0 %v1320_v50  ;;  %v1029_v50 = vpack.c.bf16 %v500_v33, %v499_v32 }
  0x8f   :  { %860 = vmatmul.mubr.f32.vlgmr.msra.gmra.mrb[2].mxu1 %v1323_v24  ;;  %393 = vmatprep.mubr.f32.mxu0 %v1225_v0  ;;  %v1061_v0 = vpack.c.bf16 %v516_v35, %v515_v34 }
  0x90   :  { %1028 = vmatpush3.bf16.msra.mxu0 %v1027_v31  ;;  %1060 = vmatpush3.bf16.msra.mxu1 %v1057_v30  ;;  %v1055_v30 = vpack.c.bf16 %v496_v28, %v495_v27 }
  0x91   :  { %1030 = vmatprep.subr.bf16.mxu0 %v1029_v50  ;;  %1062 = vmatprep.subr.bf16.mxu1 %v1061_v0 }
  0x92   :  { %394 = vmatmul.mubr.f32.gmra.mrb[6].mxu0 %v1323_v24  ;;  %v1031_v24 = vpack.c.bf16 %v484_v37, %v483_v36 }
  0x94   :  { %1032 = vmatpush3.bf16.msra.mxu0 %v1031_v24  ;;  %1064 = vmatpush3.bf16.msra.mxu1 %v1061_v0 }
  0x95   :  { %1034 = vmatprep.subr.bf16.mxu0 %v1033_v41  ;;  %1066 = vmatprep.subr.bf16.mxu1 %v1065_v45 }
  0x98   :  { %1036 = vmatpush3.bf16.msra.mxu0 %v1035_v51  ;;  %1068 = vmatpush3.bf16.msra.mxu1 %v1065_v45 }
  0x99   :  { %1038 = vmatprep.subr.bf16.mxu0 %v1037_v52  ;;  %1070 = vmatprep.subr.bf16.mxu1 %v1069_v55 }
  0x9c   :  { %1040 = vmatpush3.bf16.msra.mxu0 %v1039_v60  ;;  %1072 = vmatpush3.bf16.msra.mxu1 %v1069_v55 }
  0x9d   :  { %1042 = vmatprep.subr.bf16.mxu0 %v1041_v61  ;;  %1074 = vmatprep.subr.bf16.mxu1 %v1073_v1 }
  0xa0   :  { %1044 = vmatpush3.bf16.msra.mxu0 %v1043_v6  ;;  %1076 = vmatpush3.bf16.msra.mxu1 %v1073_v1 }
  0xa1   :  { %1046 = vmatprep.subr.bf16.mxu0 %v1045_v7  ;;  %1078 = vmatprep.subr.bf16.mxu1 %v1077_v10 }
  0xa4   :  { %1048 = vmatpush3.bf16.msra.mxu0 %v1047_v15  ;;  %1080 = vmatpush3.bf16.msra.mxu1 %v1077_v10 }
  0xa5   :  { %1050 = vmatprep.subr.bf16.mxu0 %v1049_v16  ;;  %1082 = vmatprep.subr.bf16.mxu1 %v1081_v19 }
  0xa8   :  { %1052 = vmatpush3.bf16.msra.mxu0 %v1051_v20  ;;  %1084 = vmatpush3.bf16.msra.mxu1 %v1081_v19 }
  0xa9   :  { %1054 = vmatprep.subr.bf16.mxu0 %v1053_v25  ;;  %1086 = vmatprep.subr.bf16.mxu1 %v1085_v29 }
  0xac   :  { %1056 = vmatpush3.bf16.msra.mxu0 %v1055_v30  ;;  %1088 = vmatpush3.bf16.msra.mxu1 %v1085_v29 }
 0x141   :  { %v189_v31 = vpop.f32.mrb[0].mxu0  ;;  %v826_v33 = vpop.f32.mrb[0].mxu1 }
 0x142   :  { %v191_v32 = vpop.f32.mrb[1].mxu0  ;;  %v266_v34 = vpop.f32.mrb[1].mxu1 }
 0x145   :  { %v195_v50 = vpop.f32.mrb[2].mxu0 }
 0x146   :  { %v197_v35 = vpop.f32.mrb[3].mxu0 }
 0x161   :  { %v389_v36 = vpop.f32.mrb[4].mxu0 }
 0x162   :  { %v475_v37 = vmul.f32 %v389_v36, %v189_v31  ;;  %v861_v0 = vpop.f32.mrb[2].mxu1  ;;  %v391_v24 = vpop.f32.mrb[5].mxu0 }
 0x163   :  { %v480_v38 = vmul.f32 %v861_v0, %v826_v33  ;;  %v476_v39 = vmul.f32 %v391_v24, %v191_v32  ;;  %v466_v40 = vpop.f32.mrb[3].mxu1 }
 0x164   :  { %v477_v41 = vmul.f32 %v466_v40, %v266_v34 }
 0x165   :  { %v395_v42 = vpop.f32.mrb[6].mxu0  ;;  %593 = vmatprep.mubr.f32.mxu0 %v476_v39 }
 0x166   :  { %v478_v43 = vmul.f32 %v395_v42, %v195_v50  ;;  %894 = vmatprep.mubr.f32.mxu1 %v477_v41  ;;  %v397_v44 = vpop.f32.mrb[7].mxu0  ;;  %594 = vmatmul.mubr.f32.vlgmr.msra.gmra.mrb[8].mxu0 %v475_v37 }
 0x167   :  { %v479_v45 = vmul.f32 %v397_v44, %v197_v35  ;;  %895 = vmatmul.mubr.f32.vlgmr.msra.gmra.mrb[4].mxu1 %v480_v38 }
 0x169   :  { %598 = vmatprep.mubr.f32.mxu0 %v479_v45 }
 0x16a   :  { %599 = vmatmul.mubr.f32.gmra.mrb[10].mxu0 %v478_v43 }
 0x239   :  { %v768_v46 = vpop.f32.mrb[8].mxu0 }
 0x23a   :  { %v896_v47 = vpop.f32.mrb[4].mxu1  ;;  %v769_v48 = vpop.f32.mrb[9].mxu0 }
 0x23b   :  { %v770_v49 = vadd.f32 %v769_v48, %v768_v46  ;;  %v670_v51 = vpop.f32.mrb[5].mxu1 }
 0x23d   :  { %v671_v52 = vadd.f32 %v770_v49, %v670_v51  ;;  %v771_v53 = vpop.f32.mrb[10].mxu0 }
 0x23e   :  { %v772_v54 = vpop.f32.mrb[11].mxu0 }
 0x23f   :  { %679 = vst [vmem:[#allocation10] sm:$0xff] %v671_v52  ;;  %v773_v55 = vadd.f32 %v772_v54, %v771_v53 }
 0x241   :  { %v676_v56 = vadd.f32 %v896_v47, %v773_v55 }
 0x243   :  { %680 = vst [vmem:[#allocation10 + $0x8] sm:$0xff] %v676_v56 }
 0x244   :  { %1198 = shalt.err (!%p1195_p8)
}
 0x245   :  { %s1199_s17 = scalar_lea.hbm %s1354_s4, 256 }
 0x246   :  { %p1200_p9 = scmp.ne.s32.totalorder %s1354_s4, %s1199_s17  ;;  %p1203_p10 = scmp.lt.u32.totalorder %s1199_s17, %s1354_s4 }
 0x248   :  { %p1205_p11 = pnand %p1203_p10, %p1200_p9 }
 0x24a   :  { %1208 = shalt.err (!%p1205_p11)
}
 0x24b   :  { %692 = dma.vmem_to_hbm [thread:$0]  %s687_s26, 256, %s1354_s4, [#allocation4], %s1221_s1, %s1221_s1, %s1222_s13  }
 0x24c   :  { %1215 = dma.done.wait [#allocation4], 256  }
 0x24d   :  { %1216 = vsyncadd [#allocation4], 4294967040 }
 0x24e   :  { %696 = vsyncpa [#allocation3], 1 }
 0x24f   :  { %697 = vsyncpa [#allocation6], 1 }
 0x250   :  { %698 = vsyncpa [#allocation9], 1 }
 0x251   :  { %699 = vsyncpa [#allocation4], 1 }

</bundles_post_ra>
